<compile_context>
chip_gen: v7x
topology: tpu7x:2x2x1
jax: 0.10.0
libtpu: 0.0.40
codegen_flags: <defaults>
</compile_context>

<pallas_src>
import jax
import jax.numpy as jnp
from jax.experimental import pallas as pl
from jax.experimental.pallas import tpu as pltpu

IN_FEATURES = 784
K_PAD = 896          # 7 * 128: aligned contraction dim
HIDDEN = 128
OUT_FEATURES = 10
N_PAD = 128          # lane-dense output width


def bobnet_kernel(x_ref, w1_ref, w2_ref, o_ref):
    # x_ref : (tile_b, 896)  VMEM (zero-padded input rows / K)
    # w1_ref: (896, 128)     VMEM (l1 weight, transposed + K-padded)
    # w2_ref: (128, 128)     VMEM (l2 weight, transposed + N-padded)
    # o_ref : (tile_b, 128)  VMEM (lane-dense; cols >= 10 are zero)
    h = jnp.dot(x_ref[...], w1_ref[...], preferred_element_type=jnp.float32)
    h = jnp.maximum(h, 0.0)  # nn.ReLU (on the f32 accumulator)
    o_ref[...] = jnp.dot(h, w2_ref[...],
                         preferred_element_type=jnp.float32).astype(o_ref.dtype)


def bobnet_forward(x, w1, w2, *, tile_b=256):
    """x: (B, 784) f32; w1: (128, 784) = l1.weight; w2: (10, 128) = l2.weight.

    Returns (B, 10) f32 logits.
    """
    B = x.shape[0]
    assert x.shape[1] == IN_FEATURES
    assert w1.shape == (HIDDEN, IN_FEATURES)
    assert w2.shape == (OUT_FEATURES, HIDDEN)

    # Shrink the batch tile for tiny batches (keep sublane-aligned, mult of 8).
    tile_b = min(tile_b, max(8, ((B + 7) // 8) * 8))
    n_blocks = pl.cdiv(B, tile_b)
    Bp = n_blocks * tile_b

    # Zero-pad: batch -> Bp, K -> 896, N -> 128.  Zero rows / zero K columns
    # contribute nothing to the matmuls, so results are unchanged.
    x_p = jnp.zeros((Bp, K_PAD), jnp.float32).at[:B, :IN_FEATURES].set(x)
    w1_p = jnp.zeros((K_PAD, HIDDEN), jnp.float32).at[:IN_FEATURES, :].set(w1.T)
    w2_p = jnp.zeros((HIDDEN, N_PAD), jnp.float32).at[:, :OUT_FEATURES].set(w2.T)

    out_p = pl.pallas_call(
        bobnet_kernel,
        out_shape=jax.ShapeDtypeStruct((Bp, N_PAD), jnp.float32),
        grid=(n_blocks,),
        in_specs=[
            pl.BlockSpec((tile_b, K_PAD), lambda i: (i, 0)),
            pl.BlockSpec((K_PAD, HIDDEN), lambda i: (0, 0)),   # weights resident
            pl.BlockSpec((HIDDEN, N_PAD), lambda i: (0, 0)),   # weights resident
        ],
        out_specs=pl.BlockSpec((tile_b, N_PAD), lambda i: (i, 0)),
        compiler_params=pltpu.CompilerParams(
            dimension_semantics=("parallel",),
            vmem_limit_bytes=32 << 20,
        ),
    )(x_p, w1_p, w2_p)

    return out_p[:B, :OUT_FEATURES]


if __name__ == "__main__":
    key = jax.random.PRNGKey(0)
    kx, k1, k2 = jax.random.split(key, 3)

    B = 8  # small test batch (wrapper handles padding to the tile internally)
    x = jax.random.normal(kx, (B, IN_FEATURES), dtype=jnp.float32)

    # Deterministic init mirroring nn.Linear default U(-1/sqrt(fan_in), +).
    bound1 = 1.0 / float(IN_FEATURES) ** 0.5
    bound2 = 1.0 / float(HIDDEN) ** 0.5
    w1 = jax.random.uniform(k1, (HIDDEN, IN_FEATURES), jnp.float32, -bound1, bound1)   # l1.weight
    w2 = jax.random.uniform(k2, (OUT_FEATURES, HIDDEN), jnp.float32, -bound2, bound2)  # l2.weight

    out = bobnet_forward(x, w1, w2)
    out = jax.block_until_ready(out)

    # Pure-JAX reference (quant/dequant stubs are identity in the float model).
    ref = jnp.maximum(x @ w1.T, 0.0) @ w2.T
    assert out.shape == (B, OUT_FEATURES)
    assert jnp.allclose(out, ref, atol=1e-5, rtol=1e-5), "mismatch vs reference"

    print("KERNEL_OK")
</pallas_src>

<mosaic_0001>
module attributes {stable_mosaic.version = 11 : i64} {
  func.func @bobnet_kernel(%arg0: i32, %arg1: memref<8x896xf32, #tpu.memory_space<vmem>>, %arg2: memref<896x128xf32, #tpu.memory_space<vmem>>, %arg3: memref<128x128xf32, #tpu.memory_space<vmem>>, %arg4: memref<8x128xf32, #tpu.memory_space<vmem>>) attributes {dimension_semantics = [#tpu.dimension_semantics<parallel>], iteration_bounds = array<i64: 1>, scalar_prefetch = 0 : i64, scratch_operands = 0 : i64, tpu.core_type = #tpu.core_type<tc>, window_params = [{transform_indices = @transform_0, window_bounds = array<i64: 8, 896>}, {pipeline_mode = #tpu.pipeline_mode<synchronous>, transform_indices = @transform_1, window_bounds = array<i64: 896, 128>}, {pipeline_mode = #tpu.pipeline_mode<synchronous>, transform_indices = @transform_2, window_bounds = array<i64: 128, 128>}, {transform_indices = @transform_3, window_bounds = array<i64: 8, 128>}]} {
    %c0 = arith.constant 0 : index
    %c0_0 = arith.constant 0 : index
    %0 = vector.load %arg1[%c0, %c0_0] : memref<8x896xf32, #tpu.memory_space<vmem>>, vector<8x896xf32>
    %c0_1 = arith.constant 0 : index
    %c0_2 = arith.constant 0 : index
    %1 = vector.load %arg2[%c0_1, %c0_2] : memref<896x128xf32, #tpu.memory_space<vmem>>, vector<896x128xf32>
    %cst = arith.constant dense<0.000000e+00> : vector<8x128xf32>
    %2 = tpu.matmul %0, %1, %cst {dimension_numbers = #tpu.dot_dimension_numbers<[1], [0], [0], [1], [0, 0, 1, 1], [], []>} : vector<8x896xf32>, vector<896x128xf32>, vector<8x128xf32> -> vector<8x128xf32>
    %cst_3 = arith.constant 0.000000e+00 : f32
    %3 = vector.broadcast %cst_3 : f32 to vector<8x128xf32>
    %4 = arith.maximumf %2, %3 : vector<8x128xf32>
    %c0_4 = arith.constant 0 : index
    %c0_5 = arith.constant 0 : index
    %5 = vector.load %arg3[%c0_4, %c0_5] : memref<128x128xf32, #tpu.memory_space<vmem>>, vector<128x128xf32>
    %cst_6 = arith.constant dense<0.000000e+00> : vector<8x128xf32>
    %6 = tpu.matmul %4, %5, %cst_6 {dimension_numbers = #tpu.dot_dimension_numbers<[1], [0], [0], [1], [0, 0, 1, 1], [], []>} : vector<8x128xf32>, vector<128x128xf32>, vector<8x128xf32> -> vector<8x128xf32>
    %c0_7 = arith.constant 0 : index
    %c0_8 = arith.constant 0 : index
    %7 = vector.load %arg4[%c0_7, %c0_8] : memref<8x128xf32, #tpu.memory_space<vmem>>, vector<8x128xf32>
    tpu.vector_store %arg4[%c0_7, %c0_8], %6 {strides = array<i32>} : memref<8x128xf32, #tpu.memory_space<vmem>>, vector<8x128xf32>,
    return
  }
  func.func @transform_0(%arg0: i32) -> (i32, i32) {
    %c0_i32 = arith.constant 0 : i32
    %c0_i32_0 = arith.constant 0 : i32
    return %arg0, %c0_i32 : i32, i32
  }
  func.func @transform_1(%arg0: i32) -> (i32, i32) {
    %c0_i32 = arith.constant 0 : i32
    %c0_i32_0 = arith.constant 0 : i32
    %c0_i32_1 = arith.constant 0 : i32
    return %c0_i32, %c0_i32_0 : i32, i32
  }
  func.func @transform_2(%arg0: i32) -> (i32, i32) {
    %c0_i32 = arith.constant 0 : i32
    %c0_i32_0 = arith.constant 0 : i32
    %c0_i32_1 = arith.constant 0 : i32
    return %c0_i32, %c0_i32_0 : i32, i32
  }
  func.func @transform_3(%arg0: i32) -> (i32, i32) {
    %c0_i32 = arith.constant 0 : i32
    %c0_i32_0 = arith.constant 0 : i32
    return %arg0, %c0_i32 : i32, i32
  }
}

</mosaic_0001>

<bundles_post_ra>
// kernel: tpu_custom_call.1
= control target key start
LH: loop header
LB: loop body
LE: loop exit
PB: predicated region body
PF: predicated region fallthrough
CT: control target
= control target key end

     0   :  { %8 = vsyncpa [#allocation3], 0  ;;  %s1116_s0 = inlined_call_operand.hbm [shape: f32[8,896], index: 0, kind: input, shape index: {}]   ;;  %s1117_s1 = inlined_call_operand.hbm [shape: f32[896,128], index: 1, kind: input, shape index: {}]   ;;  %s1118_s2 = inlined_call_operand.hbm [shape: f32[128,128], index: 2, kind: input, shape index: {}]   ;;  %s1119_s3 = inlined_call_operand.hbm [shape: f32[8,128], index: 3, kind: output, shape index: {}]  }
   0x1   :  { %9 = vsyncpa [#allocation6], 0 }
   0x2   :  { %10 = vsyncpa [#allocation4], 0  ;;  %s1013_s12 = smov [#allocation5]   ;;  %s919_s16 = scalar_lea.hbm %s1117_s1, 14336 }
   0x3   :  { %s26_s13 = sshll.u32 %s1013_s12, 4  ;;  %p920_p0 = scmp.ne.s32.totalorder %s1117_s1, %s919_s16  ;;  %s27_s13 = int_to_ptr.vmem [resolvable:$true] %s26_s13 }
   0x4   :  { %p923_p1 = scmp.lt.u32.totalorder %s919_s16, %s1117_s1 }
   0x6   :  { %p925_p2 = pnand %p923_p1, %p920_p0 }
   0x8   :  { %928 = shalt.err (!%p925_p2)
}
   0x9   :  { %s929_s21 = scalar_lea.vmem %s27_s13, 14336  ;;  %p934_p4 = scmp.lt.s32.totalorder %s27_s13, %s27_s13 }
   0xa   :  { %p930_p3 = scmp.ne.s32.totalorder %s27_s13, %s929_s21  ;;  %p935_p5 = scmp.lt.s32.totalorder %s929_s21, %s929_s21 }
   0xc   :  { %p936_p6 = por %p935_p5, %p934_p4 }
   0xe   :  { %p937_p7 = pnand %p936_p6, %p930_p3 }
  0x10   :  { %940 = shalt.err (!%p937_p7)
}
  0x11   :  { %s1014_s22 = smov 128   ;;  %s1015_s23 = smov 8  }
  0x12   :  { %32 = dma.hbm_to_vmem [thread:$0]  %s1117_s1, 14336, %s27_s13, [#allocation6], %s1014_s22, %s1014_s22, %s1015_s23  }
  0x13   :  { %s1016_s26 = smov [#allocation2]   ;;  %s1017_s28 = smov [#allocation7]  }
  0x14   :  { %s17_s27 = sshll.u32 %s1016_s26, 4  ;;  %s38_s29 = sshll.u32 %s1017_s28, 4  ;;  %s18_s27 = int_to_ptr.vmem [resolvable:$true] %s17_s27  ;;  %s39_s29 = int_to_ptr.vmem [resolvable:$true] %s38_s29 }
  0x15   :  { %s941_s5 = scalar_lea.hbm %s1116_s0, 896 }
  0x16   :  { %p942_p8 = scmp.ne.s32.totalorder %s1116_s0, %s941_s5  ;;  %p945_p9 = scmp.lt.u32.totalorder %s941_s5, %s1116_s0 }
  0x18   :  { %p947_p10 = pnand %p945_p9, %p942_p8 }
  0x1a   :  { %950 = shalt.err (!%p947_p10)
}
  0x1b   :  { %s951_s1 = scalar_lea.vmem %s18_s27, 896  ;;  %p956_p12 = scmp.lt.s32.totalorder %s18_s27, %s18_s27 }
  0x1c   :  { %p952_p11 = scmp.ne.s32.totalorder %s18_s27, %s951_s1  ;;  %p957_p13 = scmp.lt.s32.totalorder %s951_s1, %s951_s1 }
  0x1e   :  { %p958_p0 = por %p957_p13, %p956_p12 }
  0x20   :  { %p959_p1 = pnand %p958_p0, %p952_p11 }
  0x22   :  { %962 = shalt.err (!%p959_p1)
}
  0x23   :  { %20 = dma.hbm_to_vmem [thread:$0]  %s1116_s0, 896, %s18_s27, [#allocation3]  }
  0x24   :  { %s963_s14 = scalar_lea.hbm %s1118_s2, 2048 }
  0x25   :  { %p964_p2 = scmp.ne.s32.totalorder %s1118_s2, %s963_s14  ;;  %p967_p3 = scmp.lt.u32.totalorder %s963_s14, %s1118_s2 }
  0x27   :  { %p969_p4 = pnand %p967_p3, %p964_p2 }
  0x29   :  { %972 = shalt.err (!%p969_p4)
}
  0x2a   :  { %s973_s19 = scalar_lea.vmem %s39_s29, 2048  ;;  %p978_p6 = scmp.lt.s32.totalorder %s39_s29, %s39_s29 }
  0x2b   :  { %p974_p5 = scmp.ne.s32.totalorder %s39_s29, %s973_s19  ;;  %p979_p7 = scmp.lt.s32.totalorder %s973_s19, %s973_s19 }
  0x2d   :  { %p980_p8 = por %p979_p7, %p978_p6 }
  0x2f   :  { %p981_p9 = pnand %p980_p8, %p974_p5 }
  0x31   :  { %984 = shalt.err (!%p981_p9)
}
  0x32   :  { %44 = dma.hbm_to_vmem [thread:$0]  %s1118_s2, 2048, %s39_s29, [#allocation6], %s1014_s22, %s1014_s22, %s1015_s23  }
  0x33   :  { %1007 = dma.done.wait [#allocation3], 896  }
  0x34   :  { %1008 = vsyncadd [#allocation3], 4294966400 }
  0x35   :  { %1009 = dma.done.wait [#allocation6], 16384  }
  0x36   :  { %1010 = vsyncadd [#allocation6], 4294950912  ;;  %v77_v0 = vld [vmem:[#allocation5 + $0x80] sm:$0xff]  ;;  %v78_v1 = vld [vmem:[#allocation5 + $0x88] sm:$0xff]  ;;  %vm1019_vm0 = vmmov 0   ;;  %s1021_s2 = smov [#allocation8]  }
  0x37   :  { %v109_v2 = vld [vmem:[#allocation5 + $0x180] sm:$0xff]  ;;  %v766_v3 = vpack.c.bf16 %v78_v1, %v77_v0  ;;  %v110_v4 = vld [vmem:[#allocation5 + $0x188] sm:$0xff]  ;;  %v79_v11 = vld [vmem:[#allocation5 + $0x90] sm:$0xff]  ;;  %s547_s21 = sshll.u32 %s1021_s2, 4  ;;  %s548_s21 = int_to_ptr.vmem [resolvable:$true] %s547_s21 }
  0x38   :  { %v61_v5 = vld [vmem:[#allocation5] sm:$0xff]  ;;  %v62_v6 = vld [vmem:[#allocation5 + $0x8] sm:$0xff]  ;;  %v798_v7 = vpack.c.bf16 %v110_v4, %v109_v2  ;;  %v80_v13 = vld [vmem:[#allocation5 + $0x98] sm:$0xff]  ;;  %s985_s22 = scalar_lea.vmem %s548_s21, 128  ;;  %p990_p11 = scmp.lt.s32.totalorder %s548_s21, %s548_s21 }
  0x39   :  { %v768_v8 = vpack.c.bf16 %v62_v6, %v61_v5  ;;  %v93_v9 = vld [vmem:[#allocation5 + $0x100] sm:$0xff]  ;;  %v94_v10 = vld [vmem:[#allocation5 + $0x108] sm:$0xff]  ;;  %767 = vmatprep.subr.bf16.mxu0 %v766_v3  ;;  %v111_v14 = vld [vmem:[#allocation5 + $0x190] sm:$0xff]  ;;  %v770_v16 = vpack.c.bf16 %v80_v13, %v79_v11  ;;  %p986_p10 = scmp.ne.s32.totalorder %s548_s21, %s985_s22  ;;  %p991_p12 = scmp.lt.s32.totalorder %s985_s22, %s985_s22 }
  0x3a   :  { %v800_v12 = vpack.c.bf16 %v94_v10, %v93_v9  ;;  %v112_v15 = vld [vmem:[#allocation5 + $0x198] sm:$0xff]  ;;  %799 = vmatprep.subr.bf16.mxu1 %v798_v7  ;;  %v63_v18 = vld [vmem:[#allocation5 + $0x10] sm:$0xff]  ;;  %v81_v23 = vld [vmem:[#allocation5 + $0xa0] sm:$0xff] }
  0x3b   :  { %769 = vmatpush3.bf16.msra.mxu0 %v768_v8  ;;  %v802_v17 = vpack.c.bf16 %v112_v15, %v111_v14  ;;  %v64_v19 = vld [vmem:[#allocation5 + $0x18] sm:$0xff]  ;;  %v95_v20 = vld [vmem:[#allocation5 + $0x110] sm:$0xff]  ;;  %v82_v24 = vld [vmem:[#allocation5 + $0xa8] sm:$0xff]  ;;  %p992_p13 = por %p991_p12, %p990_p11 }
  0x3c   :  { %801 = vmatpush3.bf16.msra.mxu1 %v800_v12  ;;  %v772_v21 = vpack.c.bf16 %v64_v19, %v63_v18  ;;  %v96_v22 = vld [vmem:[#allocation5 + $0x118] sm:$0xff]  ;;  %771 = vmatprep.subr.bf16.mxu0 %v770_v16  ;;  %v774_v26 = vpack.c.bf16 %v82_v24, %v81_v23  ;;  %v113_v27 = vld [vmem:[#allocation5 + $0x1a0] sm:$0xff]  ;;  %v114_v28 = vld [vmem:[#allocation5 + $0x1a8] sm:$0xff] }
  0x3d   :  { %803 = vmatprep.subr.bf16.mxu1 %v802_v17  ;;  %v804_v25 = vpack.c.bf16 %v96_v22, %v95_v20  ;;  %v65_v29 = vld [vmem:[#allocation5 + $0x20] sm:$0xff]  ;;  %v806_v30 = vpack.c.bf16 %v114_v28, %v113_v27  ;;  %v66_v31 = vld [vmem:[#allocation5 + $0x28] sm:$0xff]  ;;  %v83_v35 = vld [vmem:[#allocation5 + $0xb0] sm:$0xff]  ;;  %p993_p0 = pnand %p992_p13, %p986_p10 }
  0x3e   :  { %v97_v32 = vld [vmem:[#allocation5 + $0x120] sm:$0xff]  ;;  %v98_v33 = vld [vmem:[#allocation5 + $0x128] sm:$0xff]  ;;  %v776_v34 = vpack.c.bf16 %v66_v31, %v65_v29  ;;  %v84_v36 = vld [vmem:[#allocation5 + $0xb8] sm:$0xff] }
  0x3f   :  { %773 = vmatpush3.bf16.msra.mxu0 %v772_v21  ;;  %v115_v37 = vld [vmem:[#allocation5 + $0x1b0] sm:$0xff]  ;;  %v808_v38 = vpack.c.bf16 %v98_v33, %v97_v32  ;;  %v778_v39 = vpack.c.bf16 %v84_v36, %v83_v35  ;;  %v116_v40 = vld [vmem:[#allocation5 + $0x1b8] sm:$0xff]  ;;  %v85_v46 = vld [vmem:[#allocation5 + $0xc0] sm:$0xff] }
  0x40   :  { %805 = vmatpush3.bf16.msra.mxu1 %v804_v25  ;;  %775 = vmatprep.subr.bf16.mxu0 %v774_v26  ;;  %v67_v41 = vld [vmem:[#allocation5 + $0x30] sm:$0xff]  ;;  %v68_v42 = vld [vmem:[#allocation5 + $0x38] sm:$0xff]  ;;  %v810_v43 = vpack.c.bf16 %v116_v40, %v115_v37  ;;  %v86_v47 = vld [vmem:[#allocation5 + $0xc8] sm:$0xff] }
  0x41   :  { %807 = vmatprep.subr.bf16.mxu1 %v806_v30  ;;  %v99_v44 = vld [vmem:[#allocation5 + $0x130] sm:$0xff]  ;;  %v100_v45 = vld [vmem:[#allocation5 + $0x138] sm:$0xff]  ;;  %v117_v48 = vld [vmem:[#allocation5 + $0x1c0] sm:$0xff]  ;;  %v780_v50 = vpack.c.bf16 %v68_v42, %v67_v41  ;;  %v782_v52 = vpack.c.bf16 %v86_v47, %v85_v46 }
  0x42   :  { %v118_v49 = vld [vmem:[#allocation5 + $0x1c8] sm:$0xff]  ;;  %v812_v51 = vpack.c.bf16 %v100_v45, %v99_v44  ;;  %v69_v53 = vld [vmem:[#allocation5 + $0x40] sm:$0xff]  ;;  %v87_v58 = vld [vmem:[#allocation5 + $0xd0] sm:$0xff] }
  0x43   :  { %777 = vmatpush3.bf16.msra.mxu0 %v776_v34  ;;  %v70_v54 = vld [vmem:[#allocation5 + $0x48] sm:$0xff]  ;;  %v101_v55 = vld [vmem:[#allocation5 + $0x140] sm:$0xff]  ;;  %v814_v56 = vpack.c.bf16 %v118_v49, %v117_v48  ;;  %v88_v59 = vld [vmem:[#allocation5 + $0xd8] sm:$0xff] }
  0x44   :  { %809 = vmatpush3.bf16.msra.mxu1 %v808_v38  ;;  %779 = vmatprep.subr.bf16.mxu0 %v778_v39  ;;  %v102_v57 = vld [vmem:[#allocation5 + $0x148] sm:$0xff]  ;;  %v119_v60 = vld [vmem:[#allocation5 + $0x1d0] sm:$0xff]  ;;  %v120_v61 = vld [vmem:[#allocation5 + $0x1d8] sm:$0xff]  ;;  %v784_v62 = vpack.c.bf16 %v70_v54, %v69_v53  ;;  %v786_v0 = vpack.c.bf16 %v88_v59, %v87_v58 }
  0x45   :  { %811 = vmatprep.subr.bf16.mxu1 %v810_v43  ;;  %v816_v63 = vpack.c.bf16 %v102_v57, %v101_v55  ;;  %v71_v1 = vld [vmem:[#allocation5 + $0x50] sm:$0xff]  ;;  %v72_v2 = vld [vmem:[#allocation5 + $0x58] sm:$0xff]  ;;  %v818_v4 = vpack.c.bf16 %v120_v61, %v119_v60  ;;  %v89_v6 = vld [vmem:[#allocation5 + $0xe0] sm:$0xff] }
  0x46   :  { %v103_v3 = vld [vmem:[#allocation5 + $0x150] sm:$0xff]  ;;  %v104_v5 = vld [vmem:[#allocation5 + $0x158] sm:$0xff]  ;;  %v90_v7 = vld [vmem:[#allocation5 + $0xe8] sm:$0xff]  ;;  %v788_v10 = vpack.c.bf16 %v72_v2, %v71_v1  ;;  %v1020_v1 = vmov 0.0  }
  0x47   :  { %781 = vmatpush3.bf16.msra.mxu0 %v780_v50  ;;  %v121_v8 = vld [vmem:[#allocation5 + $0x1e0] sm:$0xff]  ;;  %v122_v9 = vld [vmem:[#allocation5 + $0x1e8] sm:$0xff]  ;;  %v820_v13 = vpack.c.bf16 %v104_v5, %v103_v3  ;;  %v790_v14 = vpack.c.bf16 %v90_v7, %v89_v6  ;;  %v55_v16 = vld [vmem:[#allocation2 + $0x8] sm:$0xff] }
  0x48   :  { %813 = vmatpush3.bf16.msra.mxu1 %v812_v51  ;;  %783 = vmatprep.subr.bf16.mxu0 %v782_v52  ;;  %v73_v11 = vld [vmem:[#allocation5 + $0x60] sm:$0xff]  ;;  %v74_v12 = vld [vmem:[#allocation5 + $0x68] sm:$0xff]  ;;  %v822_v18 = vpack.c.bf16 %v122_v9, %v121_v8  ;;  %v91_v20 = vld [vmem:[#allocation5 + $0xf0] sm:$0xff]  ;;  %v1018_v51 = vmov 0.0|0.0  }
  0x49   :  { %815 = vmatprep.subr.bf16.mxu1 %v814_v56  ;;  %v105_v15 = vld [vmem:[#allocation5 + $0x160] sm:$0xff]  ;;  %v106_v19 = vld [vmem:[#allocation5 + $0x168] sm:$0xff]  ;;  %v92_v21 = vld [vmem:[#allocation5 + $0xf8] sm:$0xff]  ;;  %237 = vmatprep.mubr.f32.mxu0 %v55_v16  ;;  %v792_v24 = vpack.c.bf16 %v74_v12, %v73_v11 }
  0x4a   :  { %v57_v17 = vld [vmem:[#allocation2 + $0x18] sm:$0xff]  ;;  %v123_v22 = vld [vmem:[#allocation5 + $0x1f0] sm:$0xff]  ;;  %v124_v23 = vld [vmem:[#allocation5 + $0x1f8] sm:$0xff]  ;;  %v824_v25 = vpack.c.bf16 %v106_v19, %v105_v15  ;;  %v794_v26 = vpack.c.bf16 %v92_v21, %v91_v20 }
  0x4b   :  { %785 = vmatpush3.bf16.msra.mxu0 %v784_v62  ;;  %307 = vmatprep.mubr.f32.mxu1 %v57_v17  ;;  %v75_v27 = vld [vmem:[#allocation5 + $0x70] sm:$0xff]  ;;  %v76_v28 = vld [vmem:[#allocation5 + $0x78] sm:$0xff]  ;;  %v826_v30 = vpack.c.bf16 %v124_v23, %v123_v22  ;;  %v141_v32 = vld [vmem:[#allocation5 + $0x280] sm:$0xff] }
  0x4c   :  { %817 = vmatpush3.bf16.msra.mxu1 %v816_v63  ;;  %787 = vmatprep.subr.bf16.mxu0 %v786_v0  ;;  %v107_v29 = vld [vmem:[#allocation5 + $0x170] sm:$0xff]  ;;  %v108_v31 = vld [vmem:[#allocation5 + $0x178] sm:$0xff]  ;;  %v142_v33 = vld [vmem:[#allocation5 + $0x288] sm:$0xff]  ;;  %v796_v34 = vpack.c.bf16 %v76_v28, %v75_v27 }
  0x4d   :  { %819 = vmatprep.subr.bf16.mxu1 %v818_v4  ;;  %v828_v35 = vpack.c.bf16 %v108_v31, %v107_v29  ;;  %v830_v36 = vpack.c.bf16 %v142_v33, %v141_v32  ;;  %v125_v37 = vld [vmem:[#allocation5 + $0x200] sm:$0xff]  ;;  %v126_v38 = vld [vmem:[#allocation5 + $0x208] sm:$0xff]  ;;  %v143_v39 = vld [vmem:[#allocation5 + $0x290] sm:$0xff] }
  0x4e   :  { %v144_v40 = vld [vmem:[#allocation5 + $0x298] sm:$0xff]  ;;  %v157_v41 = vld [vmem:[#allocation5 + $0x300] sm:$0xff]  ;;  %v158_v42 = vld [vmem:[#allocation5 + $0x308] sm:$0xff]  ;;  %v832_v45 = vpack.c.bf16 %v126_v38, %v125_v37 }
  0x4f   :  { %789 = vmatpush3.bf16.msra.mxu0 %v788_v10  ;;  %v54_v43 = vld [vmem:[#allocation2] sm:$0xff]  ;;  %v56_v44 = vld [vmem:[#allocation2 + $0x10] sm:$0xff]  ;;  %v834_v46 = vpack.c.bf16 %v144_v40, %v143_v39  ;;  %v127_v47 = vld [vmem:[#allocation5 + $0x210] sm:$0xff]  ;;  %v863_v49 = vpack.c.bf16 %v158_v42, %v157_v41 }
  0x50   :  { %821 = vmatpush3.bf16.msra.mxu1 %v820_v13  ;;  %791 = vmatprep.subr.bf16.mxu0 %v790_v14  ;;  %v128_v48 = vld [vmem:[#allocation5 + $0x218] sm:$0xff]  ;;  %v145_v50 = vld [vmem:[#allocation5 + $0x2a0] sm:$0xff]  ;;  %v146_v52 = vld [vmem:[#allocation5 + $0x2a8] sm:$0xff] }
  0x51   :  { %823 = vmatprep.subr.bf16.mxu1 %v822_v18  ;;  %v159_v53 = vld [vmem:[#allocation5 + $0x310] sm:$0xff]  ;;  %v160_v54 = vld [vmem:[#allocation5 + $0x318] sm:$0xff]  ;;  %v836_v55 = vpack.c.bf16 %v128_v48, %v127_v47  ;;  %v129_v56 = vld [vmem:[#allocation5 + $0x220] sm:$0xff]  ;;  %v838_v57 = vpack.c.bf16 %v146_v52, %v145_v50 }
  0x52   :  { %v130_v58 = vld [vmem:[#allocation5 + $0x228] sm:$0xff]  ;;  %v866_v59 = vpack.c.bf16 %v160_v54, %v159_v53  ;;  %v147_v60 = vld [vmem:[#allocation5 + $0x2b0] sm:$0xff]  ;;  %v148_v61 = vld [vmem:[#allocation5 + $0x2b8] sm:$0xff] }
  0x53   :  { %793 = vmatpush3.bf16.msra.mxu0 %v792_v24  ;;  %v161_v62 = vld [vmem:[#allocation5 + $0x320] sm:$0xff]  ;;  %v162_v63 = vld [vmem:[#allocation5 + $0x328] sm:$0xff]  ;;  %v59_v0 = vld [vmem:[#allocation2 + $0x28] sm:$0xff]  ;;  %v840_v2 = vpack.c.bf16 %v130_v58, %v129_v56  ;;  %v842_v3 = vpack.c.bf16 %v148_v61, %v147_v60 }
  0x54   :  { %825 = vmatpush3.bf16.msra.mxu1 %v824_v25  ;;  %795 = vmatprep.subr.bf16.mxu0 %v794_v26  ;;  %v131_v4 = vld [vmem:[#allocation5 + $0x230] sm:$0xff]  ;;  %v132_v5 = vld [vmem:[#allocation5 + $0x238] sm:$0xff]  ;;  %v869_v6 = vpack.c.bf16 %v162_v63, %v161_v62  ;;  %v149_v7 = vld [vmem:[#allocation5 + $0x2c0] sm:$0xff] }
  0x55   :  { %827 = vmatprep.subr.bf16.mxu1 %v826_v30  ;;  %v150_v8 = vld [vmem:[#allocation5 + $0x2c8] sm:$0xff]  ;;  %v163_v9 = vld [vmem:[#allocation5 + $0x330] sm:$0xff]  ;;  %v164_v10 = vld [vmem:[#allocation5 + $0x338] sm:$0xff]  ;;  %v844_v11 = vpack.c.bf16 %v132_v5, %v131_v4 }
  0x56   :  { %v846_v12 = vpack.c.bf16 %v150_v8, %v149_v7  ;;  %v133_v13 = vld [vmem:[#allocation5 + $0x240] sm:$0xff]  ;;  %v134_v14 = vld [vmem:[#allocation5 + $0x248] sm:$0xff]  ;;  %v872_v15 = vpack.c.bf16 %v164_v10, %v163_v9  ;;  %v151_v16 = vld [vmem:[#allocation5 + $0x2d0] sm:$0xff] }
  0x57   :  { %797 = vmatpush3.bf16.msra.mxu0 %v796_v34  ;;  %v152_v17 = vld [vmem:[#allocation5 + $0x2d8] sm:$0xff]  ;;  %v165_v18 = vld [vmem:[#allocation5 + $0x340] sm:$0xff]  ;;  %v166_v19 = vld [vmem:[#allocation5 + $0x348] sm:$0xff]  ;;  %v848_v20 = vpack.c.bf16 %v134_v14, %v133_v13 }
  0x58   :  { %829 = vmatpush3.bf16.msra.mxu1 %v828_v35  ;;  %831 = vmatprep.subr.bf16.mxu0 %v830_v36  ;;  %v850_v21 = vpack.c.bf16 %v152_v17, %v151_v16  ;;  %v135_v22 = vld [vmem:[#allocation5 + $0x250] sm:$0xff]  ;;  %v136_v23 = vld [vmem:[#allocation5 + $0x258] sm:$0xff]  ;;  %v875_v24 = vpack.c.bf16 %v166_v19, %v165_v18  ;;  %v153_v25 = vld [vmem:[#allocation5 + $0x2e0] sm:$0xff] }
  0x59   :  { %862 = vmatprep.subr.bf16.mxu1 %v1018_v51  ;;  %v154_v26 = vld [vmem:[#allocation5 + $0x2e8] sm:$0xff]  ;;  %v167_v27 = vld [vmem:[#allocation5 + $0x350] sm:$0xff]  ;;  %v168_v28 = vld [vmem:[#allocation5 + $0x358] sm:$0xff]  ;;  %v852_v29 = vpack.c.bf16 %v136_v23, %v135_v22 }
  0x5a   :  { %238 = vmatmul.mubr.f32.vlgmr.msra.gmra.mrb[0].mxu0 %v54_v43  ;;  %v854_v30 = vpack.c.bf16 %v154_v26, %v153_v25  ;;  %v137_v31 = vld [vmem:[#allocation5 + $0x260] sm:$0xff]  ;;  %v138_v32 = vld [vmem:[#allocation5 + $0x268] sm:$0xff]  ;;  %v878_v33 = vpack.c.bf16 %v168_v28, %v167_v27  ;;  %v155_v34 = vld [vmem:[#allocation5 + $0x2f0] sm:$0xff] }
  0x5b   :  { %308 = vmatmul.mubr.f32.vlgmr.msra.gmra.mrb[0].mxu1 %v56_v44  ;;  %833 = vmatpush3.bf16.msra.mxu0 %v832_v45  ;;  %v156_v35 = vld [vmem:[#allocation5 + $0x2f8] sm:$0xff]  ;;  %v169_v36 = vld [vmem:[#allocation5 + $0x360] sm:$0xff]  ;;  %v170_v37 = vld [vmem:[#allocation5 + $0x368] sm:$0xff]  ;;  %v856_v38 = vpack.c.bf16 %v138_v32, %v137_v31 }
  0x5c   :  { %835 = vmatprep.subr.bf16.mxu0 %v834_v46  ;;  %864 = vmatpush3.bf16.msra.mxu1 %v863_v49  ;;  %v858_v39 = vpack.c.bf16 %v156_v35, %v155_v34  ;;  %v139_v40 = vld [vmem:[#allocation5 + $0x270] sm:$0xff]  ;;  %v140_v41 = vld [vmem:[#allocation5 + $0x278] sm:$0xff]  ;;  %v881_v42 = vpack.c.bf16 %v170_v37, %v169_v36  ;;  %v58_v47 = vld [vmem:[#allocation2 + $0x20] sm:$0xff] }
  0x5d   :  { %865 = vmatprep.subr.bf16.mxu1 %v1018_v51  ;;  %728 = vmatprep.mubr.msk.f32.mxu1 %vm1019_vm0, %v1020_v1  ;;  %v171_v43 = vld [vmem:[#allocation5 + $0x370] sm:$0xff]  ;;  %v172_v44 = vld [vmem:[#allocation5 + $0x378] sm:$0xff]  ;;  %v860_v45 = vpack.c.bf16 %v140_v41, %v139_v40  ;;  %v454_v49 = vld [vmem:[#allocation7] sm:$0xff] }
  0x5e   :  { %377 = vmatprep.mubr.f32.mxu0 %v59_v0  ;;  %v884_v46 = vpack.c.bf16 %v172_v44, %v171_v43  ;;  %v60_v48 = vld [vmem:[#allocation2 + $0x30] sm:$0xff]  ;;  %v455_v50 = vld [vmem:[#allocation7 + $0x8] sm:$0xff]  ;;  %v456_v52 = vld [vmem:[#allocation7 + $0x10] sm:$0xff] }
  0x5f   :  { %837 = vmatpush3.bf16.msra.mxu0 %v836_v55  ;;  %v887_v53 = vpack.c.bf16 %v455_v50, %v454_v49  ;;  %v457_v54 = vld [vmem:[#allocation7 + $0x18] sm:$0xff]  ;;  %v458_v56 = vld [vmem:[#allocation7 + $0x20] sm:$0xff]  ;;  %v463_v63 = vld [vmem:[#allocation7 + $0x48] sm:$0xff] }
  0x60   :  { %839 = vmatprep.subr.bf16.mxu0 %v838_v57  ;;  %867 = vmatpush3.bf16.msra.mxu1 %v866_v59  ;;  %v890_v55 = vpack.c.bf16 %v457_v54, %v456_v52  ;;  %v459_v57 = vld [vmem:[#allocation7 + $0x28] sm:$0xff]  ;;  %v460_v59 = vld [vmem:[#allocation7 + $0x30] sm:$0xff]  ;;  %v461_v60 = vld [vmem:[#allocation7 + $0x38] sm:$0xff] }
  0x61   :  { %868 = vmatprep.subr.bf16.mxu1 %v1018_v51  ;;  %v893_v58 = vpack.c.bf16 %v459_v57, %v458_v56  ;;  %v896_v61 = vpack.c.bf16 %v461_v60, %v460_v59  ;;  %v462_v62 = vld [vmem:[#allocation7 + $0x40] sm:$0xff]  ;;  %v467_v5 = vld [vmem:[#allocation7 + $0x68] sm:$0xff]  ;;  %v468_v7 = vld [vmem:[#allocation7 + $0x70] sm:$0xff] }
  0x62   :  { %v899_v0 = vpack.c.bf16 %v463_v63, %v462_v62  ;;  %v466_v4 = vld [vmem:[#allocation7 + $0x60] sm:$0xff]  ;;  %v469_v8 = vld [vmem:[#allocation7 + $0x78] sm:$0xff] }
  0x63   :  { %841 = vmatpush3.bf16.msra.mxu0 %v840_v2  ;;  %v465_v2 = vld [vmem:[#allocation7 + $0x58] sm:$0xff]  ;;  %v908_v9 = vpack.c.bf16 %v469_v8, %v468_v7 }
  0x64   :  { %843 = vmatprep.subr.bf16.mxu0 %v842_v3  ;;  %870 = vmatpush3.bf16.msra.mxu1 %v869_v6  ;;  %v905_v6 = vpack.c.bf16 %v467_v5, %v466_v4 }
  0x65   :  { %871 = vmatprep.subr.bf16.mxu1 %v1018_v51 }
  0x67   :  { %845 = vmatpush3.bf16.msra.mxu0 %v844_v11 }
  0x68   :  { %847 = vmatprep.subr.bf16.mxu0 %v846_v12  ;;  %873 = vmatpush3.bf16.msra.mxu1 %v872_v15 }
  0x69   :  { %874 = vmatprep.subr.bf16.mxu1 %v1018_v51 }
  0x6b   :  { %849 = vmatpush3.bf16.msra.mxu0 %v848_v20 }
  0x6c   :  { %851 = vmatprep.subr.bf16.mxu0 %v850_v21  ;;  %876 = vmatpush3.bf16.msra.mxu1 %v875_v24 }
  0x6d   :  { %877 = vmatprep.subr.bf16.mxu1 %v1018_v51 }
  0x6f   :  { %853 = vmatpush3.bf16.msra.mxu0 %v852_v29 }
  0x70   :  { %855 = vmatprep.subr.bf16.mxu0 %v854_v30  ;;  %879 = vmatpush3.bf16.msra.mxu1 %v878_v33 }
  0x71   :  { %880 = vmatprep.subr.bf16.mxu1 %v1018_v51 }
  0x73   :  { %857 = vmatpush3.bf16.msra.mxu0 %v856_v38 }
  0x74   :  { %859 = vmatprep.subr.bf16.mxu0 %v858_v39  ;;  %882 = vmatpush3.bf16.msra.mxu1 %v881_v42 }
  0x75   :  { %883 = vmatprep.subr.bf16.mxu1 %v1018_v51 }
  0x77   :  { %861 = vmatpush3.bf16.msra.mxu0 %v860_v45 }
  0x78   :  { %885 = vmatpush3.bf16.msra.mxu1 %v884_v46  ;;  %886 = vmatprep.subr.bf16.mxu0 %v1018_v51 }
  0x7a   :  { %378 = vmatmul.mubr.f32.vlgmr.msra.gmra.mrb[2].mxu0 %v58_v47 }
  0x7b   :  { %729 = vmatmul.mubr.f32.vlgmr.msra.gmra.mrb[2].mxu1 %v60_v48  ;;  %763 = vmatprep.mubr.msk.f32.mxu0 %vm1019_vm0, %v1020_v1  ;;  %v464_v1 = vld [vmem:[#allocation7 + $0x50] sm:$0xff] }
  0x7c   :  { %888 = vmatpush3.bf16.msra.mxu0 %v887_v53  ;;  %v902_v3 = vpack.c.bf16 %v465_v2, %v464_v1 }
  0x7d   :  { %889 = vmatprep.subr.bf16.mxu0 %v1018_v51 }
  0x80   :  { %891 = vmatpush3.bf16.msra.mxu0 %v890_v55 }
  0x81   :  { %892 = vmatprep.subr.bf16.mxu0 %v1018_v51 }
  0x84   :  { %894 = vmatpush3.bf16.msra.mxu0 %v893_v58 }
  0x85   :  { %895 = vmatprep.subr.bf16.mxu0 %v1018_v51 }
  0x88   :  { %897 = vmatpush3.bf16.msra.mxu0 %v896_v61 }
  0x89   :  { %898 = vmatprep.subr.bf16.mxu0 %v1018_v51 }
  0x8c   :  { %900 = vmatpush3.bf16.msra.mxu0 %v899_v0 }
  0x8d   :  { %901 = vmatprep.subr.bf16.mxu0 %v1018_v51 }
  0x90   :  { %903 = vmatpush3.bf16.msra.mxu0 %v902_v3 }
  0x91   :  { %904 = vmatprep.subr.bf16.mxu0 %v1018_v51 }
  0x94   :  { %906 = vmatpush3.bf16.msra.mxu0 %v905_v6 }
  0x95   :  { %907 = vmatprep.subr.bf16.mxu0 %v1018_v51 }
  0x98   :  { %909 = vmatpush3.bf16.msra.mxu0 %v908_v9 }
 0x12d   :  { %v589_v10 = vpop.f32.mrb[0].mxu0 }
 0x12e   :  { %v624_v11 = vpop.f32.mrb[0].mxu1  ;;  %v590_v12 = vpop.f32.mrb[1].mxu0 }
 0x12f   :  { %v591_v13 = vadd.f32 %v590_v12, %v589_v10  ;;  %v625_v14 = vpop.f32.mrb[1].mxu1 }
 0x130   :  { %v626_v15 = vadd.f32 %v625_v14, %v624_v11 }
 0x132   :  { %v310_v16 = vadd.f32 %v626_v15, %v591_v13 }
 0x14d   :  { %v659_v17 = vpop.f32.mrb[2].mxu0 }
 0x14e   :  { %v660_v18 = vpop.f32.mrb[3].mxu0  ;;  %v449_v19 = vpop.f32.mrb[2].mxu1 }
 0x14f   :  { %v661_v20 = vadd.f32 %v660_v18, %v659_v17  ;;  %v730_v21 = vpop.f32.mrb[3].mxu1 }
 0x151   :  { %v380_v22 = vadd.f32 %v661_v20, %v310_v16 }
 0x153   :  { %v450_v23 = vadd.f32 %v449_v19, %v380_v22 }
 0x155   :  { %v453_v24 = vmax.f32 %v450_v23, 0.0 }
 0x157   :  { %764 = vmatmul.mubr.f32.vlgmr.msra.gmra.mrb[4].mxu0 %v453_v24 }
 0x22a   :  { %v536_v51 = vpop.f32.mrb[4].mxu0 }
 0x22b   :  { %540 = vst [vmem:[#allocation8] sm:$0xff] %v536_v51  ;;  %v765_v25 = vpop.f32.mrb[5].mxu0 }
 0x22c   :  { %996 = shalt.err (!%p993_p0)
}
 0x22d   :  { %s997_s25 = scalar_lea.hbm %s1119_s3, 128 }
 0x22e   :  { %p998_p1 = scmp.ne.s32.totalorder %s1119_s3, %s997_s25  ;;  %p1001_p2 = scmp.lt.u32.totalorder %s997_s25, %s1119_s3 }
 0x230   :  { %p1003_p3 = pnand %p1001_p2, %p998_p1 }
 0x232   :  { %1006 = shalt.err (!%p1003_p3)
}
 0x233   :  { %550 = dma.vmem_to_hbm [thread:$0]  %s548_s21, 128, %s1119_s3, [#allocation4]  }
 0x234   :  { %1011 = dma.done.wait [#allocation4], 128  }
 0x235   :  { %1012 = vsyncadd [#allocation4], 4294967168 }
 0x236   :  { %554 = vsyncpa [#allocation3], 1 }
 0x237   :  { %555 = vsyncpa [#allocation6], 1 }
 0x238   :  { %556 = vsyncpa [#allocation4], 1 }

</bundles_post_ra>
